<compile_context>
chip_gen: v6e
topology: v6e:2x2x1
jax: 0.10.0
libtpu: 0.0.40
codegen_flags: <defaults>
</compile_context>

<pallas_src>
import functools

import jax
import jax.numpy as jnp
from jax.experimental import pallas as pl
from jax.experimental.pallas import tpu as pltpu


def _round_up(x: int, m: int) -> int:
    return (x + m - 1) // m * m


# ---------------------------------------------------------------------------
# Kernel: reads x and the packed parameter slab, writes Q-values.
# Section offsets/sizes are compile-time Python ints baked in via closure.
# ---------------------------------------------------------------------------
def _make_net_kernel(n_states, hidden, n_actions, off_b1, off_w2, off_b2):
    def kernel(x_ref, p_ref, out_ref):
        x = x_ref[...]                                            # [tb, n_states]
        w1 = p_ref[0:n_states, 0:hidden]                          # [n_states, hidden]
        b1 = p_ref[off_b1:off_b1 + 1, 0:hidden]                   # [1, hidden]
        w2 = p_ref[off_w2:off_w2 + hidden, 0:n_actions]           # [hidden, n_actions]
        b2 = p_ref[off_b2:off_b2 + 1, 0:n_actions]                # [1, n_actions]

        h = jnp.dot(x, w1, preferred_element_type=jnp.float32) + b1
        h = jnp.maximum(h, 0.0)                                   # ReLU
        out_ref[...] = (jnp.dot(h, w2, preferred_element_type=jnp.float32)
                        + b2).astype(out_ref.dtype)               # [tb, n_actions]

    return kernel


# ---------------------------------------------------------------------------
# One-time parameter packing (done at init, NOT per forward call).
# Layout (rows, 8-aligned sections; columns padded to 128):
#   rows [0, n_states)            : W1^T  ([in, out] layout)
#   row  off_b1                   : b1
#   rows [off_w2, off_w2+hidden)  : W2^T
#   row  off_b2                   : b2
# ---------------------------------------------------------------------------
def pack_params(w1, b1, w2, b2):
    hidden, n_states = w1.shape
    n_actions = w2.shape[0]

    off_b1 = _round_up(n_states, 8)
    off_w2 = _round_up(off_b1 + 1, 8)
    off_b2 = _round_up(off_w2 + hidden, 8)
    rows = _round_up(off_b2 + 1, 8)
    cols = _round_up(max(hidden, n_actions), 128)

    slab = jnp.zeros((rows, cols), jnp.float32)
    slab = slab.at[0:n_states, 0:hidden].set(w1.T.astype(jnp.float32))
    slab = slab.at[off_b1, 0:hidden].set(b1.astype(jnp.float32))
    slab = slab.at[off_w2:off_w2 + hidden, 0:n_actions].set(w2.T.astype(jnp.float32))
    slab = slab.at[off_b2, 0:n_actions].set(b2.astype(jnp.float32))

    meta = dict(n_states=n_states, hidden=hidden, n_actions=n_actions,
                off_b1=off_b1, off_w2=off_w2, off_b2=off_b2)
    return slab, meta


# ---------------------------------------------------------------------------
# Forward pass.  `slab` + `meta` come from pack_params (built once).
# ---------------------------------------------------------------------------
def net_forward(x, slab, meta, *, batch_tile=128):
    B, n_states = x.shape
    hidden = meta["hidden"]
    n_actions = meta["n_actions"]
    assert n_states == meta["n_states"]

    kernel = _make_net_kernel(n_states, hidden, n_actions,
                              meta["off_b1"], meta["off_w2"], meta["off_b2"])

    cost = pl.CostEstimate(
        flops=2 * B * (n_states * hidden + hidden * n_actions),
        transcendentals=0,
        bytes_accessed=4 * (x.size + slab.size + B * n_actions),
    )

    # ---- small-batch / inference path: single block, no grid machinery ----
    if B <= batch_tile:
        return pl.pallas_call(
            kernel,
            out_shape=jax.ShapeDtypeStruct((B, n_actions), jnp.float32),
            in_specs=[pl.BlockSpec(memory_space=pltpu.MemorySpace.VMEM),
                      pl.BlockSpec(memory_space=pltpu.MemorySpace.VMEM)],
            out_specs=pl.BlockSpec(memory_space=pltpu.MemorySpace.VMEM),
            cost_estimate=cost,
        )(x, slab)

    # ---- training path: tile the batch, parameter slab stays resident ----
    tb = batch_tile                       # multiple of 8 (f32 sublane)
    assert tb % 8 == 0
    b_pad = _round_up(B, tb)
    x_p = x if b_pad == B else jnp.pad(x, ((0, b_pad - B), (0, 0)))

    out = pl.pallas_call(
        kernel,
        out_shape=jax.ShapeDtypeStruct((b_pad, n_actions), jnp.float32),
        grid=(b_pad // tb,),
        in_specs=[pl.BlockSpec((tb, n_states), lambda i: (i, 0)),
                  pl.BlockSpec(slab.shape, lambda i: (0, 0))],
        out_specs=pl.BlockSpec((tb, n_actions), lambda i: (i, 0)),
        compiler_params=pltpu.CompilerParams(
            dimension_semantics=("parallel",)),   # v7x: both TCs take half the grid
        cost_estimate=cost,
    )(x_p, slab)
    return out[:B] if b_pad != B else out


# ---------------------------------------------------------------------------
# Init (matches PyTorch module: weight ~ N(0, 0.1); default Linear bias init)
# ---------------------------------------------------------------------------
def init_params(key, n_states, n_actions, hidden=50):
    k1, k2, k3, k4 = jax.random.split(key, 4)
    w1 = 0.1 * jax.random.normal(k1, (hidden, n_states), dtype=jnp.float32)
    b1 = jax.random.uniform(k2, (hidden,), dtype=jnp.float32,
                            minval=-1.0 / jnp.sqrt(n_states),
                            maxval=1.0 / jnp.sqrt(n_states))
    w2 = 0.1 * jax.random.normal(k3, (n_actions, hidden), dtype=jnp.float32)
    b2 = jax.random.uniform(k4, (n_actions,), dtype=jnp.float32,
                            minval=-1.0 / jnp.sqrt(hidden),
                            maxval=1.0 / jnp.sqrt(hidden))
    return w1, b1, w2, b2


def reference_forward(x, w1, b1, w2, b2):
    h = jnp.maximum(x @ w1.T + b1, 0.0)
    return h @ w2.T + b2


if __name__ == "__main__":
    # CartPole-style DQN shapes: N_STATES=4, N_ACTIONS=2.
    N_STATES = 4
    N_ACTIONS = 2
    HIDDEN = 50

    key = jax.random.PRNGKey(0)
    kx, kb, kp = jax.random.split(key, 3)
    w1, b1, w2, b2 = init_params(kp, N_STATES, N_ACTIONS, HIDDEN)

    # Pack parameters once (weight transposes hoisted out of the forward).
    slab, meta = pack_params(w1, b1, w2, b2)
    slab = jax.block_until_ready(slab)

    # --- small-batch (action-selection) path: no grid ---
    x_small = jax.random.normal(kx, (2, N_STATES), dtype=jnp.float32)
    out_small = jax.block_until_ready(net_forward(x_small, slab, meta))
    ref_small = reference_forward(x_small, w1, b1, w2, b2)
    assert out_small.shape == (2, N_ACTIONS)
    assert jnp.allclose(out_small, ref_small, atol=1e-5, rtol=1e-5), \
        "small-batch mismatch vs reference"

    # --- training-batch path: batch tiled, weights resident, parallel grid ---
    x_batch = jax.random.normal(kb, (32, N_STATES), dtype=jnp.float32)
    out_batch = jax.block_until_ready(
        net_forward(x_batch, slab, meta, batch_tile=16))
    ref_batch = reference_forward(x_batch, w1, b1, w2, b2)
    assert out_batch.shape == (32, N_ACTIONS)
    assert jnp.allclose(out_batch, ref_batch, atol=1e-5, rtol=1e-5), \
        "batched mismatch vs reference"

    print("KERNEL_OK")
</pallas_src>

<mosaic_0001>
module attributes {stable_mosaic.version = 11 : i64} {
  func.func @kernel(%arg0: memref<2x4xf32, #tpu.memory_space<vmem>>, %arg1: memref<80x128xf32, #tpu.memory_space<vmem>>, %arg2: memref<2x2xf32, #tpu.memory_space<vmem>>) attributes {dimension_semantics = [], scalar_prefetch = 0 : i64, scratch_operands = 0 : i64, tpu.core_type = #tpu.core_type<tc>} {
    %c0 = arith.constant 0 : index
    %c0_0 = arith.constant 0 : index
    %0 = vector.load %arg0[%c0, %c0_0] : memref<2x4xf32, #tpu.memory_space<vmem>>, vector<2x4xf32>
    %c0_1 = arith.constant 0 : index
    %c0_2 = arith.constant 0 : index
    %1 = vector.load %arg1[%c0_1, %c0_2] : memref<80x128xf32, #tpu.memory_space<vmem>>, vector<4x50xf32>
    %c8 = arith.constant 8 : index
    %c0_3 = arith.constant 0 : index
    %2 = vector.load %arg1[%c8, %c0_3] : memref<80x128xf32, #tpu.memory_space<vmem>>, vector<1x50xf32>
    %c16 = arith.constant 16 : index
    %c0_4 = arith.constant 0 : index
    %3 = vector.load %arg1[%c16, %c0_4] : memref<80x128xf32, #tpu.memory_space<vmem>>, vector<50x2xf32>
    %c72 = arith.constant 72 : index
    %c0_5 = arith.constant 0 : index
    %4 = vector.load %arg1[%c72, %c0_5] : memref<80x128xf32, #tpu.memory_space<vmem>>, vector<1x2xf32>
    %cst = arith.constant dense<0.000000e+00> : vector<2x50xf32>
    %5 = tpu.matmul %0, %1, %cst {dimension_numbers = #tpu.dot_dimension_numbers<[1], [0], [0], [1], [0, 0, 1, 1], [], []>} : vector<2x4xf32>, vector<4x50xf32>, vector<2x50xf32> -> vector<2x50xf32>
    %6 = vector.broadcast %2 : vector<1x50xf32> to vector<2x50xf32>
    %7 = arith.addf %5, %6 : vector<2x50xf32>
    %cst_6 = arith.constant 0.000000e+00 : f32
    %8 = vector.broadcast %cst_6 : f32 to vector<2x50xf32>
    %9 = arith.maximumf %7, %8 : vector<2x50xf32>
    %cst_7 = arith.constant dense<0.000000e+00> : vector<2x2xf32>
    %10 = tpu.matmul %9, %3, %cst_7 {dimension_numbers = #tpu.dot_dimension_numbers<[1], [0], [0], [1], [0, 0, 1, 1], [], []>} : vector<2x50xf32>, vector<50x2xf32>, vector<2x2xf32> -> vector<2x2xf32>
    %11 = vector.broadcast %4 : vector<1x2xf32> to vector<2x2xf32>
    %12 = arith.addf %10, %11 : vector<2x2xf32>
    %c0_8 = arith.constant 0 : index
    %c0_9 = arith.constant 0 : index
    %13 = vector.load %arg2[%c0_8, %c0_9] : memref<2x2xf32, #tpu.memory_space<vmem>>, vector<2x2xf32>
    tpu.vector_store %arg2[%c0_8, %c0_9], %12 {strides = array<i32>} : memref<2x2xf32, #tpu.memory_space<vmem>>, vector<2x2xf32>,
    return
  }
}

</mosaic_0001>

<bundles_post_ra>
// kernel: tpu_custom_call.1
= control target key start
LH: loop header
LB: loop body
LE: loop exit
PB: predicated region body
PF: predicated region fallthrough
CT: control target
= control target key end

     0   :  { %7 = vsyncpa [#allocation3], 0  ;;  %s374_s0 = inlined_call_operand.hbm [shape: f32[2,4], index: 0, kind: input, shape index: {}]   ;;  %s375_s1 = inlined_call_operand.hbm [shape: f32[80,128], index: 1, kind: input, shape index: {}]   ;;  %s376_s2 = inlined_call_operand.hbm [shape: f32[2,2], index: 2, kind: output, shape index: {}]  }
   0x1   :  { %8 = vsyncpa [#allocation6], 0 }
   0x2   :  { %9 = vsyncpa [#allocation4], 0  ;;  %s343_s9 = smov [#allocation2]   ;;  %s344_s11 = smov [#allocation5]  }
   0x3   :  { %s16_s10 = sshll.u32 %s343_s9, 4  ;;  %s25_s12 = sshll.u32 %s344_s11, 4  ;;  %s17_s10 = int_to_ptr.vmem [resolvable:$true] %s16_s10  ;;  %s26_s12 = int_to_ptr.vmem [resolvable:$true] %s25_s12 }
   0x4   :  { %s285_s13 = scalar_lea.vmem %s17_s10, 32  ;;  %p290_p1 = scmp.lt.s32.totalorder %s17_s10, %s17_s10 }
   0x5   :  { %p286_p0 = scmp.ne.s32.totalorder %s17_s10, %s285_s13  ;;  %p291_p2 = scmp.lt.s32.totalorder %s285_s13, %s285_s13 }
   0x7   :  { %p292_p3 = por %p291_p2, %p290_p1 }
   0x9   :  { %p293_p4 = pnand %p292_p3, %p286_p0 }
   0xb   :  { %296 = shalt.err (!%p293_p4)
}
   0xc   :  { %19 = dma.hbm_to_vmem [thread:$0]  %s374_s0, 32, %s17_s10, [#allocation3]  }
   0xd   :  { %s305_s16 = scalar_lea.vmem %s26_s12, 1280  ;;  %p310_p6 = scmp.lt.s32.totalorder %s26_s12, %s26_s12 }
   0xe   :  { %p306_p5 = scmp.ne.s32.totalorder %s26_s12, %s305_s16  ;;  %p311_p7 = scmp.lt.s32.totalorder %s305_s16, %s305_s16 }
  0x10   :  { %p312_p8 = por %p311_p7, %p310_p6 }
  0x12   :  { %p313_p9 = pnand %p312_p8, %p306_p5 }
  0x14   :  { %316 = shalt.err (!%p313_p9)
}
  0x15   :  { %s345_s17 = smov 128   ;;  %s346_s18 = smov 8  }
  0x16   :  { %31 = dma.hbm_to_vmem [thread:$0]  %s375_s1, 1280, %s26_s12, [#allocation6], %s345_s17, %s345_s17, %s346_s18  }
  0x17   :  { %337 = dma.done.wait [#allocation3], 32  }
  0x18   :  { %338 = vsyncadd [#allocation3], 4294967264 }
  0x19   :  { %339 = dma.done.wait [#allocation6], 1280  }
  0x1a   :  { %340 = vsyncadd [#allocation6], 4294966016  ;;  %v347_v0 = vmov 0.0   ;;  %vm348_vm0 = vmmov 0   ;;  %vm57_vm1 = vcmask 1043456   ;;  %vm140_vm2 = vcmask 1041408  }
  0x1b   :  { %248 = vmatprep.subr.mxu0 %v347_v0  ;;  %250 = vmatprep.mubr.msk.f32.mxu0 %vm348_vm0, %v347_v0  ;;  %vm53_vm3 = vcmask 31744   ;;  %v39_v1 = vld [vmem:[#allocation5] sm:$0xf]  ;;  %v38_v2 = vld [vmem:[#allocation2] sm:$0x3]  ;;  %v45_v5 = vld [vmem:[#allocation5 + $0x30] sm:$0xff] }
  0x1c   :  { %253 = vmatprep.subr.mxu1 %v347_v0  ;;  %267 = vmatprep.mubr.msk.f32.mxu1 %vm348_vm0, %v347_v0  ;;  %v47_v3 = vld [vmem:[#allocation5 + $0x40] sm:$0x3]  ;;  %v46_v4 = vld [vmem:[#allocation5 + $0x38] sm:$0xff]  ;;  %v44_v6 = vld [vmem:[#allocation5 + $0x28] sm:$0xff]  ;;  %vm136_vm4 = vcmask 408576   ;;  %s349_s0 = smov [#allocation7]  }
  0x1d   :  { %249 = vmatpush3.msk.msra.mxu0 %vm57_vm1, %v39_v1  ;;  %254 = vmatpush3.msk.msra.mxu1 %vm140_vm2, %v47_v3  ;;  %v43_v7 = vld [vmem:[#allocation5 + $0x20] sm:$0xff]  ;;  %v42_v8 = vld [vmem:[#allocation5 + $0x18] sm:$0xff]  ;;  %v41_v9 = vld [vmem:[#allocation5 + $0x10] sm:$0xff]  ;;  %s222_s1 = sshll.u32 %s349_s0, 4  ;;  %vm214_vm5 = vcmask 9216   ;;  %s223_s1 = int_to_ptr.vmem [resolvable:$true] %s222_s1 }
  0x1e   :  { %251 = vmatmul.mubr.msk.f32.vlgmr.msra.gmra.mxu0 %vm53_vm3, %v38_v2  ;;  %255 = vmatprep.subr.mxu1 %v347_v0  ;;  %v232_v10 = vld [vmem:[#allocation5 + $0x8] ss:$0 sm:$0xff]  ;;  %s317_s21 = scalar_lea.vmem %s223_s1, 32  ;;  %p322_p11 = scmp.lt.s32.totalorder %s223_s1, %s223_s1 }
  0x1f   :  { %256 = vmatpush3.msra.mxu1 %v46_v4  ;;  %v235_v15 = vld [vmem:[#allocation5 + $0x48] ss:$0 sm:$0xff]  ;;  %p318_p10 = scmp.ne.s32.totalorder %s223_s1, %s317_s21  ;;  %p323_p12 = scmp.lt.s32.totalorder %s317_s21, %s317_s21 }
  0x20   :  { %257 = vmatprep.subr.mxu1 %v347_v0 }
  0x21   :  { %258 = vmatpush3.msra.mxu1 %v45_v5  ;;  %p324_p13 = por %p323_p12, %p322_p11 }
  0x22   :  { %259 = vmatprep.subr.mxu1 %v347_v0 }
  0x23   :  { %260 = vmatpush3.msra.mxu1 %v44_v6  ;;  %p325_p0 = pnand %p324_p13, %p318_p10 }
  0x24   :  { %261 = vmatprep.subr.mxu1 %v347_v0 }
  0x25   :  { %262 = vmatpush3.msra.mxu1 %v43_v7 }
  0x26   :  { %263 = vmatprep.subr.mxu1 %v347_v0 }
  0x27   :  { %264 = vmatpush3.msra.mxu1 %v42_v8 }
  0x28   :  { %265 = vmatprep.subr.mxu1 %v347_v0 }
  0x29   :  { %266 = vmatpush3.msra.mxu1 %v41_v9 }
  0xde   :  { %v127_v11 = vpop.f32.mrf.mxu0 }
  0xdf   :  { %v128_v12 = vadd.f32 %v232_v10, %v127_v11 }
  0xe0   :  { %v252_v13 = vpop.f32.mrf.mxu0 }
  0xe1   :  { %v131_v14 = vmax.f32 %v128_v12, 0.0 }
  0xe3   :  { %268 = vmatmul.mubr.msk.f32.vlgmr.msra.gmra.mxu1 %vm136_vm4, %v131_v14 }
 0x1a3   :  { %v210_v16 = vpop.f32.mrf.mxu1 }
 0x1a4   :  { %v211_v17 = vadd.f32 %v235_v15, %v210_v16 }
 0x1a5   :  { %v269_v18 = vpop.f32.mrf.mxu1 }
 0x1a6   :  { %215 = vst.msk [vmem:[#allocation7] sm:$0x3] %vm214_vm5, %v211_v17 }
 0x1a7   :  { %328 = shalt.err (!%p325_p0)
}
 0x1a8   :  { %225 = dma.vmem_to_hbm [thread:$0]  %s223_s1, 32, %s376_s2, [#allocation4]  }
 0x1a9   :  { %341 = dma.done.wait [#allocation4], 32  }
 0x1aa   :  { %342 = vsyncadd [#allocation4], 4294967264 }
 0x1ab   :  { %229 = vsyncpa [#allocation3], 1 }
 0x1ac   :  { %230 = vsyncpa [#allocation6], 1 }
 0x1ad   :  { %231 = vsyncpa [#allocation4], 1 }

</bundles_post_ra>
